<compile_context>
chip_gen: v5e
topology: v5e:2x2
jax: 0.10.0
libtpu: 0.0.40
codegen_flags: <defaults>
</compile_context>

<pallas_src>
import functools

import jax
import jax.numpy as jnp
from jax.experimental import pallas as pl
from jax.experimental.pallas import tpu as pltpu

_VMEM_LIMIT_BYTES = 32 * 1024 * 1024


def _round_up(a, b):
    return (a + b - 1) // b * b


def _pick_tile_rows(n_rows, c_pad, itemsize):
    # ~2 MiB per input buffer; with double-buffered in+out this stays far
    # below the scoped-VMEM default on every generation (incl. v7x's 64 MiB).
    budget = 2 * 1024 * 1024
    max_rows = max(8, (budget // (c_pad * itemsize)) // 8 * 8)
    tile = min(1024, max_rows, _round_up(n_rows, 8))
    return max(8, tile - (tile % 8))


def _pad_2d(x2, r_pad, c_pad):
    n, c = x2.shape
    if (r_pad, c_pad) != (n, c):
        x2 = jnp.pad(x2, ((0, r_pad - n), (0, c_pad - c)))
    return x2


# ---------------------------------------------------------------------------
# Kernels
# ---------------------------------------------------------------------------
def _actnorm_stats_kernel(x_ref, bias_ref, logstd_ref, sum_acc, sq_acc,
                          *, n_rows, scale):
    """Reduction sweep: per-channel sum / sum-of-squares -> bias, log_std.

    x_ref:      (tile_rows, Cpad) VMEM input tile
    bias_ref:   (1, Cpad) f32 output (resident across the grid)
    logstd_ref: (1, Cpad) f32 output (resident across the grid)
    sum_acc, sq_acc: (1, Cpad) f32 VMEM scratch accumulators
    """
    i = pl.program_id(0)

    @pl.when(i == 0)
    def _():
        sum_acc[...] = jnp.zeros_like(sum_acc)
        sq_acc[...] = jnp.zeros_like(sq_acc)

    x = x_ref[...].astype(jnp.float32)
    sum_acc[...] += jnp.sum(x, axis=0, keepdims=True)
    sq_acc[...] += jnp.sum(x * x, axis=0, keepdims=True)

    @pl.when(i == pl.num_programs(0) - 1)
    def _():
        inv_n = jnp.float32(1.0 / n_rows)
        mean = sum_acc[...] * inv_n
        # Single-pass variance; clamp tiny negative cancellation residue.
        var = jnp.maximum(sq_acc[...] * inv_n - mean * mean, 0.0)
        bias_ref[...] = -mean
        logstd_ref[...] = jnp.log(jnp.float32(scale) / (jnp.sqrt(var) + 1e-6))


def _actnorm_apply_fwd_kernel(x_ref, bias_ref, logstd_ref, out_ref):
    """Apply sweep (reverse=False): out = (x + bias) * exp(log_std)."""
    x = x_ref[...].astype(jnp.float32)
    y = (x + bias_ref[...]) * jnp.exp(logstd_ref[...])
    out_ref[...] = y.astype(out_ref.dtype)


def _actnorm_apply_rev_kernel(x_ref, bias_ref, logstd_ref, out_ref):
    """Apply sweep (reverse=True): out = x * exp(-log_std) - bias."""
    x = x_ref[...].astype(jnp.float32)
    y = x * jnp.exp(-logstd_ref[...]) - bias_ref[...]
    out_ref[...] = y.astype(out_ref.dtype)


# ---------------------------------------------------------------------------
# Wrappers
# ---------------------------------------------------------------------------
def actnorm_forward(x, logdet=None, *, scale=1.0, tile_rows=None):
    """Forward pass with data-dependent init (module's first training call)."""
    B, T, C = x.shape
    N = B * T
    c_pad = _round_up(C, 128)
    if tile_rows is None:
        tile_rows = _pick_tile_rows(N, c_pad, jnp.dtype(x.dtype).itemsize)
    r_pad = _round_up(N, tile_rows)
    n_tiles = r_pad // tile_rows

    x2 = _pad_2d(x.reshape(N, C), r_pad, c_pad)

    row_spec = pl.BlockSpec((tile_rows, c_pad), lambda i: (i, 0))
    par_spec = pl.BlockSpec((1, c_pad), lambda i: (0, 0))

    # Sweep 1: statistics (reduction over row tiles).
    bias_p, logstd_p = pl.pallas_call(
        functools.partial(_actnorm_stats_kernel, n_rows=N, scale=float(scale)),
        grid=(n_tiles,),
        in_specs=[row_spec],
        out_specs=(par_spec, par_spec),
        out_shape=(jax.ShapeDtypeStruct((1, c_pad), jnp.float32),
                   jax.ShapeDtypeStruct((1, c_pad), jnp.float32)),
        scratch_shapes=[pltpu.VMEM((1, c_pad), jnp.float32),
                        pltpu.VMEM((1, c_pad), jnp.float32)],
        compiler_params=pltpu.CompilerParams(
            dimension_semantics=("arbitrary",),
            vmem_limit_bytes=_VMEM_LIMIT_BYTES),
    )(x2)

    # Sweep 2: apply (embarrassingly parallel over row tiles).
    out_p = pl.pallas_call(
        _actnorm_apply_fwd_kernel,
        grid=(n_tiles,),
        in_specs=[row_spec, par_spec, par_spec],
        out_specs=row_spec,
        out_shape=jax.ShapeDtypeStruct((r_pad, c_pad), x.dtype),
        compiler_params=pltpu.CompilerParams(
            dimension_semantics=("parallel",),
            vmem_limit_bytes=_VMEM_LIMIT_BYTES),
    )(x2, bias_p, logstd_p)

    out = out_p[:N, :C].reshape(B, T, C)
    bias = bias_p[:, :C].reshape(1, 1, C)
    log_std = logstd_p[:, :C].reshape(1, 1, C)
    if logdet is not None:
        # dlogdet = sum(log_std) * timesteps  (scalar work stays in the wrapper)
        logdet = logdet + jnp.sum(log_std) * jnp.float32(T)
    return out, bias, log_std, logdet


def actnorm_reverse(x, bias, log_std, logdet=None, *, tile_rows=None):
    """Reverse pass using initialized parameters."""
    B, T, C = x.shape
    N = B * T
    c_pad = _round_up(C, 128)
    if tile_rows is None:
        tile_rows = _pick_tile_rows(N, c_pad, jnp.dtype(x.dtype).itemsize)
    r_pad = _round_up(N, tile_rows)
    n_tiles = r_pad // tile_rows

    x2 = _pad_2d(x.reshape(N, C), r_pad, c_pad)
    bias_p = _pad_2d(bias.reshape(1, C).astype(jnp.float32), 1, c_pad)
    logstd_p = _pad_2d(log_std.reshape(1, C).astype(jnp.float32), 1, c_pad)

    row_spec = pl.BlockSpec((tile_rows, c_pad), lambda i: (i, 0))
    par_spec = pl.BlockSpec((1, c_pad), lambda i: (0, 0))

    out_p = pl.pallas_call(
        _actnorm_apply_rev_kernel,
        grid=(n_tiles,),
        in_specs=[row_spec, par_spec, par_spec],
        out_specs=row_spec,
        out_shape=jax.ShapeDtypeStruct((r_pad, c_pad), x.dtype),
        compiler_params=pltpu.CompilerParams(
            dimension_semantics=("parallel",),
            vmem_limit_bytes=_VMEM_LIMIT_BYTES),
    )(x2, bias_p, logstd_p)

    out = out_p[:N, :C].reshape(B, T, C)
    if logdet is not None:
        logdet = logdet - jnp.sum(log_std.astype(jnp.float32)) * jnp.float32(T)
    return out, logdet


# ---------------------------------------------------------------------------
# Pure-JAX reference (two-pass, matches the PyTorch module)
# ---------------------------------------------------------------------------
def actnorm_forward_ref(x, logdet, *, scale=1.0):
    xf = x.astype(jnp.float32)
    bias = -jnp.mean(xf, axis=(0, 1), keepdims=True)
    var = jnp.mean((xf + bias) ** 2, axis=(0, 1), keepdims=True)
    log_std = jnp.log(scale / (jnp.sqrt(var) + 1e-6))
    out = (xf + bias) * jnp.exp(log_std)
    logdet_out = logdet + jnp.sum(log_std) * x.shape[1]
    return out.astype(x.dtype), bias, log_std, logdet_out


if __name__ == "__main__":
    key = jax.random.PRNGKey(0)
    B, T, C = 2, 8, 32
    scale = 1.0

    kx, _ = jax.random.split(key)
    x = jax.random.normal(kx, (B, T, C), dtype=jnp.float32) * 2.5 + 0.7
    logdet0 = jnp.zeros((B,), dtype=jnp.float32)

    r_out, r_bias, r_logstd, r_logdet = actnorm_forward_ref(x, logdet0, scale=scale)

    # Forward (data-dependent init), default tile (single grid step here).
    out, bias, log_std, logdet_out = actnorm_forward(x, logdet0, scale=scale)
    jax.block_until_ready((out, bias, log_std, logdet_out))
    assert jnp.allclose(out, r_out, atol=1e-4, rtol=1e-4)
    assert jnp.allclose(bias, r_bias, atol=1e-5, rtol=1e-5)
    assert jnp.allclose(log_std, r_logstd, atol=1e-4, rtol=1e-4)
    assert jnp.allclose(logdet_out, r_logdet, atol=1e-3, rtol=1e-4)

    # Forward again with a tiny tile to exercise the multi-step accumulator
    # (pl.when init / finalize across the reduction grid axis).
    out2, bias2, log_std2, logdet2 = actnorm_forward(
        x, logdet0, scale=scale, tile_rows=8)
    jax.block_until_ready((out2, bias2, log_std2, logdet2))
    assert jnp.allclose(out2, r_out, atol=1e-4, rtol=1e-4)
    assert jnp.allclose(bias2, r_bias, atol=1e-5, rtol=1e-5)
    assert jnp.allclose(log_std2, r_logstd, atol=1e-4, rtol=1e-4)
    assert jnp.allclose(logdet2, r_logdet, atol=1e-3, rtol=1e-4)

    # Reverse path round-trip: reverse(forward(x)) ~= x, logdet back to 0.
    x_rec, logdet_rec = actnorm_reverse(out, bias, log_std, logdet_out)
    jax.block_until_ready((x_rec, logdet_rec))
    assert jnp.allclose(x_rec, x, atol=1e-3, rtol=1e-3)
    assert jnp.allclose(logdet_rec, logdet0, atol=1e-3)

    print("KERNEL_OK")
</pallas_src>

<mosaic_0001>
module attributes {stable_mosaic.version = 11 : i64} {
  func.func @_actnorm_stats_kernel(%arg0: i32, %arg1: memref<16x128xf32, #tpu.memory_space<vmem>>, %arg2: memref<1x128xf32, #tpu.memory_space<vmem>>, %arg3: memref<1x128xf32, #tpu.memory_space<vmem>>, %arg4: memref<1x128xf32, #tpu.memory_space<vmem>>, %arg5: memref<1x128xf32, #tpu.memory_space<vmem>>) attributes {dimension_semantics = [#tpu.dimension_semantics<arbitrary>], iteration_bounds = array<i64: 1>, scalar_prefetch = 0 : i64, scratch_operands = 2 : i64, tpu.core_type = #tpu.core_type<tc>, window_params = [{transform_indices = @transform_0, window_bounds = array<i64: 16, 128>}, {pipeline_mode = #tpu.pipeline_mode<synchronous>, transform_indices = @transform_1, window_bounds = array<i64: 1, 128>}, {pipeline_mode = #tpu.pipeline_mode<synchronous>, transform_indices = @transform_2, window_bounds = array<i64: 1, 128>}]} {
    %c0_i32 = arith.constant 0 : i32
    %0 = arith.cmpi eq, %arg0, %c0_i32 : i32
    %1 = arith.extui %0 : i1 to i32
    %c0_i32_0 = arith.constant 0 : i32
    %2 = arith.cmpi ne, %1, %c0_i32_0 : i32
    scf.if %2 {
      %cst_13 = arith.constant 0.000000e+00 : f32
      %18 = vector.broadcast %cst_13 : f32 to vector<1x128xf32>
      %c0_14 = arith.constant 0 : index
      %c0_15 = arith.constant 0 : index
      %19 = vector.load %arg4[%c0_14, %c0_15] : memref<1x128xf32, #tpu.memory_space<vmem>>, vector<1x128xf32>
      tpu.vector_store %arg4[%c0_14, %c0_15], %18 {strides = array<i32>} : memref<1x128xf32, #tpu.memory_space<vmem>>, vector<1x128xf32>,
      %cst_16 = arith.constant 0.000000e+00 : f32
      %20 = vector.broadcast %cst_16 : f32 to vector<1x128xf32>
      %c0_17 = arith.constant 0 : index
      %c0_18 = arith.constant 0 : index
      %21 = vector.load %arg5[%c0_17, %c0_18] : memref<1x128xf32, #tpu.memory_space<vmem>>, vector<1x128xf32>
      tpu.vector_store %arg5[%c0_17, %c0_18], %20 {strides = array<i32>} : memref<1x128xf32, #tpu.memory_space<vmem>>, vector<1x128xf32>,
    } else {
    }
    %c0 = arith.constant 0 : index
    %c0_1 = arith.constant 0 : index
    %3 = vector.load %arg1[%c0, %c0_1] : memref<16x128xf32, #tpu.memory_space<vmem>>, vector<16x128xf32>
    %c0_2 = arith.constant 0 : index
    %c0_3 = arith.constant 0 : index
    %4 = vector.load %arg4[%c0_2, %c0_3] : memref<1x128xf32, #tpu.memory_space<vmem>>, vector<1x128xf32>
    %cst = arith.constant dense<0.000000e+00> : vector<128xf32>
    %5 = vector.multi_reduction <add>, %3, %cst [0] : vector<16x128xf32> to vector<128xf32>
    %6 = vector.shape_cast %5 : vector<128xf32> to vector<1x128xf32>
    %7 = arith.addf %4, %6 : vector<1x128xf32>
    %c0_4 = arith.constant 0 : index
    %c0_5 = arith.constant 0 : index
    %8 = vector.load %arg4[%c0_4, %c0_5] : memref<1x128xf32, #tpu.memory_space<vmem>>, vector<1x128xf32>
    tpu.vector_store %arg4[%c0_4, %c0_5], %7 {strides = array<i32>} : memref<1x128xf32, #tpu.memory_space<vmem>>, vector<1x128xf32>,
    %c0_6 = arith.constant 0 : index
    %c0_7 = arith.constant 0 : index
    %9 = vector.load %arg5[%c0_6, %c0_7] : memref<1x128xf32, #tpu.memory_space<vmem>>, vector<1x128xf32>
    %10 = arith.mulf %3, %3 : vector<16x128xf32>
    %cst_8 = arith.constant dense<0.000000e+00> : vector<128xf32>
    %11 = vector.multi_reduction <add>, %10, %cst_8 [0] : vector<16x128xf32> to vector<128xf32>
    %12 = vector.shape_cast %11 : vector<128xf32> to vector<1x128xf32>
    %13 = arith.addf %9, %12 : vector<1x128xf32>
    %c0_9 = arith.constant 0 : index
    %c0_10 = arith.constant 0 : index
    %14 = vector.load %arg5[%c0_9, %c0_10] : memref<1x128xf32, #tpu.memory_space<vmem>>, vector<1x128xf32>
    tpu.vector_store %arg5[%c0_9, %c0_10], %13 {strides = array<i32>} : memref<1x128xf32, #tpu.memory_space<vmem>>, vector<1x128xf32>,
    %c0_i32_11 = arith.constant 0 : i32
    %15 = arith.cmpi eq, %arg0, %c0_i32_11 : i32
    %16 = arith.extui %15 : i1 to i32
    %c0_i32_12 = arith.constant 0 : i32
    %17 = arith.cmpi ne, %16, %c0_i32_12 : i32
    scf.if %17 {
      %c0_13 = arith.constant 0 : index
      %c0_14 = arith.constant 0 : index
      %18 = vector.load %arg4[%c0_13, %c0_14] : memref<1x128xf32, #tpu.memory_space<vmem>>, vector<1x128xf32>
      %cst_15 = arith.constant 6.250000e-02 : f32
      %19 = vector.broadcast %cst_15 : f32 to vector<1x128xf32>
      %20 = arith.mulf %18, %19 : vector<1x128xf32>
      %c0_16 = arith.constant 0 : index
      %c0_17 = arith.constant 0 : index
      %21 = vector.load %arg5[%c0_16, %c0_17] : memref<1x128xf32, #tpu.memory_space<vmem>>, vector<1x128xf32>
      %cst_18 = arith.constant 6.250000e-02 : f32
      %22 = vector.broadcast %cst_18 : f32 to vector<1x128xf32>
      %23 = arith.mulf %21, %22 : vector<1x128xf32>
      %24 = arith.mulf %20, %20 : vector<1x128xf32>
      %25 = arith.subf %23, %24 : vector<1x128xf32>
      %cst_19 = arith.constant 0.000000e+00 : f32
      %26 = vector.broadcast %cst_19 : f32 to vector<1x128xf32>
      %27 = arith.maximumf %25, %26 : vector<1x128xf32>
      %cst_20 = arith.constant 0.000000e+00 : f32
      %28 = vector.broadcast %cst_20 : f32 to vector<1x128xf32>
      %29 = arith.subf %28, %20 : vector<1x128xf32>
      %c0_21 = arith.constant 0 : index
      %c0_22 = arith.constant 0 : index
      %30 = vector.load %arg2[%c0_21, %c0_22] : memref<1x128xf32, #tpu.memory_space<vmem>>, vector<1x128xf32>
      tpu.vector_store %arg2[%c0_21, %c0_22], %29 {strides = array<i32>} : memref<1x128xf32, #tpu.memory_space<vmem>>, vector<1x128xf32>,
      %31 = math.sqrt %27 : vector<1x128xf32>
      %cst_23 = arith.constant 9.99999997E-7 : f32
      %32 = vector.broadcast %cst_23 : f32 to vector<1x128xf32>
      %33 = arith.addf %31, %32 : vector<1x128xf32>
      %cst_24 = arith.constant 1.000000e+00 : f32
      %34 = vector.broadcast %cst_24 : f32 to vector<1x128xf32>
      %35 = arith.divf %34, %33 : vector<1x128xf32>
      %36 = math.log %35 : vector<1x128xf32>
      %c0_25 = arith.constant 0 : index
      %c0_26 = arith.constant 0 : index
      %37 = vector.load %arg3[%c0_25, %c0_26] : memref<1x128xf32, #tpu.memory_space<vmem>>, vector<1x128xf32>
      tpu.vector_store %arg3[%c0_25, %c0_26], %36 {strides = array<i32>} : memref<1x128xf32, #tpu.memory_space<vmem>>, vector<1x128xf32>,
    } else {
    }
    return
  }
  func.func @transform_0(%arg0: i32) -> (i32, i32) {
    %c0_i32 = arith.constant 0 : i32
    %c0_i32_0 = arith.constant 0 : i32
    return %arg0, %c0_i32 : i32, i32
  }
  func.func @transform_1(%arg0: i32) -> (i32, i32) {
    %c0_i32 = arith.constant 0 : i32
    %c0_i32_0 = arith.constant 0 : i32
    %c0_i32_1 = arith.constant 0 : i32
    return %c0_i32, %c0_i32_0 : i32, i32
  }
  func.func @transform_2(%arg0: i32) -> (i32, i32) {
    %c0_i32 = arith.constant 0 : i32
    %c0_i32_0 = arith.constant 0 : i32
    %c0_i32_1 = arith.constant 0 : i32
    return %c0_i32, %c0_i32_0 : i32, i32
  }
}

</mosaic_0001>

<bundles_post_ra>
// kernel: tpu_custom_call.1
= control target key start
LH: loop header
LB: loop body
LE: loop exit
PB: predicated region body
PF: predicated region fallthrough
CT: control target
= control target key end

     0   :  { %8 = vsyncpa [#allocation5], 0  ;;  %s254_s0 = inlined_call_operand.hbm [shape: f32[16,128], index: 0, kind: input, shape index: {}]   ;;  %s255_s1 = inlined_call_operand.hbm [shape: f32[1,128], index: 1, kind: output, shape index: {0}]   ;;  %s256_s2 = inlined_call_operand.hbm [shape: f32[1,128], index: 2, kind: output, shape index: {1}]  }
   0x1   :  { %9 = vsyncpa [#allocation6], 0 }
   0x2   :  { %10 = vsyncpa [#allocation9], 0  ;;  %s15_s11 = sshll.u32 %s254_s0, 4  ;;  %s224_s12 = smov [#allocation4]   ;;  %s16_s11 = int_to_ptr.hbm [resolvable:$true] %s15_s11 }
   0x3   :  { %s17_s13 = sshll.u32 %s224_s12, 4  ;;  %s225_s14 = smov 128   ;;  %s18_s13 = int_to_ptr.vmem [resolvable:$true] %s17_s13 }
   0x4   :  { %s226_s15 = smov 8  }
   0x5   :  { %23 = dma.hbm_to_vmem [thread:$0]  %s16_s11, 256, %s18_s13, [#allocation5], %s225_s14, %s225_s14, %s226_s15  }
   0x6   :  { %218 = dma.done.wait [#allocation5], 256  }
   0x7   :  { %219 = vsyncadd [#allocation5], 4294967040  ;;  %v227_v0 = vmov 0.0   ;;  %v34_v1 = vld [vmem:[#allocation4] sm:$0xff]  ;;  %v35_v2 = vld [vmem:[#allocation4 + $0x8] sm:$0xff]  ;;  %s228_s0 = smov [#allocation7]  }
   0x8   :  { %32 = vst [vmem:[#allocation2] sm:$0x1] %v227_v0  ;;  %v37_v3 = vadd.f32 %v35_v2, %v34_v1  ;;  %v47_v4 = vmul.f32 %v34_v1, %v34_v1  ;;  %v48_v5 = vmul.f32 %v35_v2, %v35_v2  ;;  %s106_s16 = sshll.u32 %s228_s0, 4  ;;  %s108_s19 = sshll.u32 %s255_s1, 4  ;;  %s107_s16 = int_to_ptr.vmem [resolvable:$true] %s106_s16  ;;  %s109_s19 = int_to_ptr.hbm [resolvable:$true] %s108_s19 }
   0x9   :  { %33 = vst [vmem:[#allocation3] sm:$0x1] %v227_v0  ;;  %s229_s1 = smov [#allocation8]   ;;  %s119_s23 = sshll.u32 %s256_s2, 4  ;;  %s120_s23 = int_to_ptr.hbm [resolvable:$true] %s119_s23 }
   0xa   :  { %v38_v6 = vrot.slane %v37_v3, 4  ;;  %v49_v7 = vadd.f32 %v48_v5, %v47_v4  ;;  %s117_s20 = sshll.u32 %s229_s1, 4  ;;  %s118_s20 = int_to_ptr.vmem [resolvable:$true] %s117_s20 }
   0xc   :  { %v39_v8 = vadd.f32 %v38_v6, %v37_v3  ;;  %v50_v9 = vrot.slane %v49_v7, 4 }
   0xe   :  { %v40_v10 = vrot.slane %v39_v8, 2  ;;  %v51_v11 = vadd.f32 %v50_v9, %v49_v7 }
   0xf   :  { %v36_v16 = vld [vmem:[#allocation2] sm:$0x1] }
  0x10   :  { %v41_v12 = vadd.f32 %v40_v10, %v39_v8  ;;  %v52_v13 = vrot.slane %v51_v11, 2  ;;  %v46_v19 = vld [vmem:[#allocation3] sm:$0x1] }
  0x12   :  { %v42_v14 = vrot.slane %v41_v12, 1  ;;  %v53_v15 = vadd.f32 %v52_v13, %v51_v11 }
  0x14   :  { %v43_v17 = vadd.f32 %v42_v14, %v41_v12  ;;  %v54_v18 = vrot.slane %v53_v15, 1 }
  0x16   :  { %v44_v20 = vadd.f32 %v43_v17, %v36_v16  ;;  %v55_v21 = vadd.f32 %v54_v18, %v53_v15 }
  0x18   :  { %45 = vst [vmem:[#allocation2] sm:$0x1] %v44_v20  ;;  %v56_v22 = vadd.f32 %v55_v21, %v46_v19 }
  0x1a   :  { %57 = vst [vmem:[#allocation3] sm:$0x1] %v56_v22 }
  0x1f   :  { %v61_v23 = vld [vmem:[#allocation2] sm:$0x1] }
  0x20   :  { %v62_v24 = vmul.f32 0.0625, %v61_v23 }
  0x21   :  { %v63_v25 = vld [vmem:[#allocation3] sm:$0x1] }
  0x22   :  { %v64_v26 = vmul.f32 0.0625, %v63_v25  ;;  %v65_v27 = vmul.f32 %v62_v24, %v62_v24  ;;  %v68_v28 = vsub.f32 0.0, %v62_v24 }
  0x24   :  { %v66_v29 = vsub.f32 %v64_v26, %v65_v27  ;;  %69 = vst [vmem:[#allocation7] sm:$0x1] %v68_v28 }
  0x25   :  { %111 = dma.vmem_to_hbm [thread:$0]  %s107_s16, 16, %s109_s19, [#allocation6]  }
  0x26   :  { %v67_v30 = vmax.f32 %v66_v29, 0.0 }
  0x28   :  { %140 = vrsqrt.f32 %v67_v30  ;;  %vm77_vm0 = vcmp.eq.f32.partialorder %v67_v30, inf  ;;  %v80_v38 = vand.u32 2147483648, %v67_v30  ;;  %vm79_vm1 = vcmp.eq.f32.partialorder %v67_v30, 0.0 }
  0x2e   :  { %v141_v31 = vpop.eup %140 }
  0x2f   :  { %v71_v32 = vmul.f32 %v141_v31, %v67_v30 }
  0x31   :  { %v72_v33 = vmul.f32 %v141_v31, %v71_v32 }
  0x33   :  { %v73_v34 = vmul.f32 0.5, %v72_v33 }
  0x35   :  { %v74_v35 = vsub.f32 1.5, %v73_v34 }
  0x37   :  { %v75_v36 = vmul.f32 %v141_v31, %v74_v35 }
  0x39   :  { %v76_v37 = vmul.f32 %v75_v36, %v67_v30 }
  0x3b   :  { %v78_v39 = vsel %vm77_vm0, %v67_v30, %v76_v37 }
  0x3c   :  { %v81_v40 = vsel %vm79_vm1, %v80_v38, %v78_v39 }
  0x3d   :  { %v82_v41 = vadd.f32 1e-06, %v81_v40 }
  0x3f   :  { %142 = vrcp.f32 %v82_v41  ;;  %v94_v45 = vand.u32 2147483648, %v82_v41  ;;  %v92_v47 = vand.u32 2147483647, %v82_v41  ;;  %vm88_vm3 = vweird.f32 %v82_v41 }
  0x41   :  { %v95_v49 = vor.u32 1.1754944e-38, %v94_v45  ;;  %vm93_vm5 = vcmp.eq.f32.partialorder %v92_v47, 8.507059e+37 }
  0x45   :  { %v143_v42 = vpop.eup %142 }
  0x46   :  { %v84_v43 = vmul.f32 %v143_v42, %v82_v41  ;;  %vm89_vm2 = vweird.f32 %v143_v42 }
  0x47   :  { %vm90_vm4 = vmor %vm88_vm3, %vm89_vm2 }
  0x48   :  { %v85_v44 = vsub.f32 1.0, %v84_v43 }
  0x4a   :  { %v86_v46 = vmul.f32 %v143_v42, %v85_v44 }
  0x4c   :  { %v87_v48 = vadd.f32 %v143_v42, %v86_v46 }
  0x4e   :  { %v91_v50 = vsel %vm90_vm4, %v143_v42, %v87_v48 }
  0x4f   :  { %v96_v51 = vsel %vm93_vm5, %v95_v49, %v91_v50 }
  0x50   :  { %144 = vlog2.f32 %v96_v51 }
  0x56   :  { %v145_v52 = vpop.eup %144 }
  0x57   :  { %v99_v53 = vmul.f32 0.6931472, %v145_v52 }
  0x59   :  { %100 = vst [vmem:[#allocation8] sm:$0x1] %v99_v53 }
  0x5a   :  { %122 = dma.vmem_to_hbm [thread:$0]  %s118_s20, 16, %s120_s23, [#allocation9]  }
  0x5b   :  { %220 = dma.done.wait [#allocation6], 16  }
  0x5c   :  { %221 = vsyncadd [#allocation6], 4294967280 }
  0x5d   :  { %222 = dma.done.wait [#allocation9], 16  }
  0x5e   :  { %223 = vsyncadd [#allocation9], 4294967280 }
  0x5f   :  { %131 = vsyncpa [#allocation5], 1 }
  0x60   :  { %132 = vsyncpa [#allocation6], 1 }
  0x61   :  { %133 = vsyncpa [#allocation9], 1 }

</bundles_post_ra>
